<compile_context>
chip_gen: v7x
topology: tpu7x:2x2x1
jax: 0.10.0
libtpu: 0.0.40
codegen_flags: <defaults>
</compile_context>

<pallas_src>
import functools

import jax
import jax.numpy as jnp
from jax import lax
from jax.experimental import pallas as pl
from jax.experimental.pallas import tpu as pltpu


def _ls_ce_kernel(x_ref, tgt_ref, loss_ref, *, smoothing):
    """One grid step: per-row label-smoothed CE for a block of rows.

    x_ref    : (TB, C) logits tile (native dtype)      (VMEM)
    tgt_ref  : (TB, 1) int32 target indices tile       (VMEM)
    loss_ref : (TB, 1) f32 per-row loss tile           (VMEM)
    """
    x = x_ref[...].astype(jnp.float32)                     # (TB, C) f32 compute
    tb, c = x.shape

    # Numerically stable log-sum-exp over the class (lane) axis.
    m = jnp.max(x, axis=-1, keepdims=True)                 # (TB, 1)
    z = x - m                                              # (TB, C)
    lse = jnp.log(jnp.sum(jnp.exp(z), axis=-1, keepdims=True))  # (TB, 1)

    # Fused weighted reduction:
    #   loss = conf*(lse - z_t) + smooth*(lse - mean(z))
    #        = lse - sum((conf*onehot + smooth/C) * z)      since conf+smooth == 1
    tgt = tgt_ref[...]                                     # (TB, 1) int32
    col_ids = lax.broadcasted_iota(jnp.int32, (tb, c), 1)  # (TB, C)
    confidence = 1.0 - smoothing
    w = jnp.where(col_ids == tgt, confidence, 0.0) + (smoothing / c)
    loss_ref[...] = lse - jnp.sum(w * z, axis=-1, keepdims=True)


def _row_align(dtype):
    itemsize = jnp.dtype(dtype).itemsize
    if itemsize >= 4:
        return 8        # f32 / i32 sublane tile
    if itemsize == 2:
        return 16       # bf16 / fp16 pack 2 rows per sublane
    return 32           # int8 / fp8


def _choose_block_rows(n, c, dtype):
    """Pick a row-block size giving ~2 MiB logits tiles (pipeline friendly)."""
    align = _row_align(dtype)
    itemsize = jnp.dtype(dtype).itemsize
    target_tile_bytes = 2 * 1024 * 1024
    rows = max(align, (target_tile_bytes // max(1, c * itemsize)) // align * align)
    n_aligned = -(-n // align) * align
    return min(rows, n_aligned)


def label_smoothing_cross_entropy(x, target, smoothing=0.05, *, block_rows=None):
    """x: (N, C) float logits; target: (N,) int class indices. Returns scalar f32."""
    n, c = x.shape
    align = _row_align(x.dtype)
    if block_rows is None:
        block_rows = _choose_block_rows(n, c, x.dtype)
    assert block_rows % align == 0 or block_rows == n, (
        f"block_rows={block_rows} must be a multiple of {align} (or equal N)")

    num_blocks = -(-n // block_rows)
    n_pad = num_blocks * block_rows
    if n_pad != n:
        # Padded rows are computed (finite, zero logits / class 0) and then
        # simply dropped in the final reduction below.
        x = jnp.pad(x, ((0, n_pad - n), (0, 0)))
        target = jnp.pad(target, (0, n_pad - n))
    tgt2d = target.astype(jnp.int32).reshape(n_pad, 1)

    kernel = functools.partial(_ls_ce_kernel, smoothing=float(smoothing))

    per_row = pl.pallas_call(
        kernel,
        out_shape=jax.ShapeDtypeStruct((n_pad, 1), jnp.float32),
        grid_spec=pltpu.PrefetchScalarGridSpec(
            num_scalar_prefetch=0,
            grid=(num_blocks,),
            in_specs=[
                pl.BlockSpec((block_rows, c), lambda i: (i, 0)),   # native dtype
                pl.BlockSpec((block_rows, 1), lambda i: (i, 0)),
            ],
            out_specs=pl.BlockSpec((block_rows, 1), lambda i: (i, 0)),
        ),
        compiler_params=pltpu.CompilerParams(
            dimension_semantics=("parallel",),        # independent row blocks
            vmem_limit_bytes=48 * 1024 * 1024,        # fits v7x, raises v5e default
        ),
    )(x, tgt2d)

    # Tiny final reduction (N floats) done in plain JAX; drop padded rows.
    return jnp.sum(per_row[:n, 0]) / n


def _reference(x, target, smoothing=0.05):
    confidence = 1.0 - smoothing
    logprobs = jax.nn.log_softmax(x.astype(jnp.float32), axis=-1)
    nll = -jnp.take_along_axis(logprobs, target[:, None], axis=-1)[:, 0]
    smooth = -jnp.mean(logprobs, axis=-1)
    return jnp.mean(confidence * nll + smoothing * smooth)


if __name__ == "__main__":
    key = jax.random.PRNGKey(0)
    kx, kt = jax.random.split(key)

    N, C = 40, 128  # small batch of logits over 128 classes
    x_f32 = jax.random.normal(kx, (N, C), dtype=jnp.float32)
    target = jax.random.randint(kt, (N,), 0, C, dtype=jnp.int32)

    # f32, auto block size (single block, no padding).
    loss = jax.block_until_ready(label_smoothing_cross_entropy(x_f32, target))
    ref = _reference(x_f32, target)
    assert jnp.allclose(loss, ref, atol=1e-5, rtol=1e-5), (loss, ref)

    # f32, forced multi-block grid with row padding (40 -> 48, 3 blocks).
    loss_mb = jax.block_until_ready(
        label_smoothing_cross_entropy(x_f32, target, block_rows=16))
    assert jnp.allclose(loss_mb, ref, atol=1e-5, rtol=1e-5), (loss_mb, ref)

    # bf16 logits streamed in native dtype (f32 math inside the kernel).
    x_bf16 = x_f32.astype(jnp.bfloat16)
    loss_bf = jax.block_until_ready(
        label_smoothing_cross_entropy(x_bf16, target, block_rows=16))
    ref_bf = _reference(x_bf16, target)
    assert jnp.allclose(loss_bf, ref_bf, atol=1e-4, rtol=1e-4), (loss_bf, ref_bf)

    print("KERNEL_OK")
</pallas_src>

<mosaic_0001>
module attributes {stable_mosaic.version = 11 : i64} {
  func.func @_ls_ce_kernel(%arg0: i32, %arg1: memref<40x128xf32, #tpu.memory_space<vmem>>, %arg2: memref<40x1xi32, #tpu.memory_space<vmem>>, %arg3: memref<40x1xf32, #tpu.memory_space<vmem>>) attributes {dimension_semantics = [#tpu.dimension_semantics<parallel>], iteration_bounds = array<i64: 1>, scalar_prefetch = 0 : i64, scratch_operands = 0 : i64, tpu.core_type = #tpu.core_type<tc>, window_params = [{transform_indices = @transform_0, window_bounds = array<i64: 40, 128>}, {transform_indices = @transform_1, window_bounds = array<i64: 40, 1>}, {transform_indices = @transform_2, window_bounds = array<i64: 40, 1>}]} {
    %c0 = arith.constant 0 : index
    %c0_0 = arith.constant 0 : index
    %0 = vector.load %arg1[%c0, %c0_0] : memref<40x128xf32, #tpu.memory_space<vmem>>, vector<40x128xf32>
    %cst = arith.constant dense<0xFF800000> : vector<40xf32>
    %1 = vector.multi_reduction <maximumf>, %0, %cst [1] : vector<40x128xf32> to vector<40xf32>
    %2 = vector.shape_cast %1 : vector<40xf32> to vector<40x1xf32>
    %3 = vector.broadcast %2 : vector<40x1xf32> to vector<40x128xf32>
    %4 = arith.subf %0, %3 : vector<40x128xf32>
    %5 = math.exp %4 : vector<40x128xf32>
    %cst_1 = arith.constant dense<0.000000e+00> : vector<40xf32>
    %6 = vector.multi_reduction <add>, %5, %cst_1 [1] : vector<40x128xf32> to vector<40xf32>
    %7 = vector.shape_cast %6 : vector<40xf32> to vector<40x1xf32>
    %8 = math.log %7 : vector<40x1xf32>
    %c0_2 = arith.constant 0 : index
    %c0_3 = arith.constant 0 : index
    %9 = vector.load %arg2[%c0_2, %c0_3] : memref<40x1xi32, #tpu.memory_space<vmem>>, vector<40x1xi32>
    %10 = tpu.iota {dimensions = array<i32: 1>} : vector<40x128xi32>
    %11 = vector.broadcast %9 : vector<40x1xi32> to vector<40x128xi32>
    %12 = arith.cmpi eq, %10, %11 : vector<40x128xi32>
    %cst_4 = arith.constant 0.949999988 : f32
    %cst_5 = arith.constant 0.000000e+00 : f32
    %13 = vector.broadcast %cst_4 : f32 to vector<40x128xf32>
    %14 = vector.broadcast %cst_5 : f32 to vector<40x128xf32>
    %15 = arith.select %12, %13, %14 : vector<40x128xi1>, vector<40x128xf32>
    %cst_6 = arith.constant 3.906250e-04 : f32
    %16 = vector.broadcast %cst_6 : f32 to vector<40x128xf32>
    %17 = arith.addf %15, %16 : vector<40x128xf32>
    %18 = arith.mulf %17, %4 : vector<40x128xf32>
    %cst_7 = arith.constant dense<0.000000e+00> : vector<40xf32>
    %19 = vector.multi_reduction <add>, %18, %cst_7 [1] : vector<40x128xf32> to vector<40xf32>
    %20 = vector.shape_cast %19 : vector<40xf32> to vector<40x1xf32>
    %21 = arith.subf %8, %20 : vector<40x1xf32>
    %c0_8 = arith.constant 0 : index
    %c0_9 = arith.constant 0 : index
    %22 = vector.load %arg3[%c0_8, %c0_9] : memref<40x1xf32, #tpu.memory_space<vmem>>, vector<40x1xf32>
    tpu.vector_store %arg3[%c0_8, %c0_9], %21 {strides = array<i32>} : memref<40x1xf32, #tpu.memory_space<vmem>>, vector<40x1xf32>,
    return
  }
  func.func @transform_0(%arg0: i32) -> (i32, i32) {
    %c0_i32 = arith.constant 0 : i32
    %c0_i32_0 = arith.constant 0 : i32
    return %arg0, %c0_i32 : i32, i32
  }
  func.func @transform_1(%arg0: i32) -> (i32, i32) {
    %c0_i32 = arith.constant 0 : i32
    %c0_i32_0 = arith.constant 0 : i32
    return %arg0, %c0_i32 : i32, i32
  }
  func.func @transform_2(%arg0: i32) -> (i32, i32) {
    %c0_i32 = arith.constant 0 : i32
    %c0_i32_0 = arith.constant 0 : i32
    return %arg0, %c0_i32 : i32, i32
  }
}

</mosaic_0001>

<bundles_post_ra>
// kernel: tpu_custom_call.1
= control target key start
LH: loop header
LB: loop body
LE: loop exit
PB: predicated region body
PF: predicated region fallthrough
CT: control target
= control target key end

     0   :  { %v152_v2 = vmov 0   ;;  %v66_v26 = vlaneseq  ;;  %v153_v34 = vmov 0.0   ;;  %vm118_vm5 = vcmask 7168   ;;  %s219_s0 = inlined_call_operand.vmem [shape: f32[40,128], index: 0, kind: input, shape index: {}]   ;;  %s220_s1 = inlined_call_operand.vmem [shape: s32[40,1], index: 1, kind: input, shape index: {}]   ;;  %s221_s2 = inlined_call_operand.vmem [shape: f32[40,1], index: 2, kind: output, shape index: {}]  }
   0x1   :  { %v13_v0 = vld [vmem:[%s219_s0 + $0x10] sm:$0xff]  ;;  %v11_v1 = vld [vmem:[%s219_s0] sm:$0xff]  ;;  %130 = vset.pattern.permute.xlu1 %v152_v2  ;;  %131 = vset.pattern.permute.xlu0 %v152_v2  ;;  %v14_v3 = vld [vmem:[%s219_s0 + $0x18] sm:$0xff] }
   0x2   :  { %20 = vmax.xlane.f32.xlu1 %v13_v0  ;;  %16 = vmax.xlane.f32.xlu0 %v11_v1  ;;  %v12_v4 = vld [vmem:[%s219_s0 + $0x8] sm:$0xff]  ;;  %v15_v5 = vld [vmem:[%s219_s0 + $0x20] sm:$0xff]  ;;  %v63_v7 = vld [vmem:[%s220_s1 + $0x10] sm:$0xff]  ;;  %v67_v29 = vand.u32 127, %v66_v26 }
   0x3   :  { %v61_v6 = vld [vmem:[%s220_s1] sm:$0xff]  ;;  %v64_v8 = vld [vmem:[%s220_s1 + $0x18] sm:$0xff]  ;;  %v62_v9 = vld [vmem:[%s220_s1 + $0x8] sm:$0xff] }
   0x4   :  { %v65_v10 = vld [vmem:[%s220_s1 + $0x20] sm:$0xff] }
   0x6   :  { %22 = vmax.xlane.f32.xlu1 %v14_v3  ;;  %18 = vmax.xlane.f32.xlu0 %v12_v4 }
   0xa   :  { %24 = vmax.xlane.f32.xlu0 %v15_v5 }
  0x17   :  { %69 = vperm.xlu1 %130, %v61_v6  }
  0x1b   :  { %75 = vperm.xlu1 %130, %v63_v7  }
  0x1f   :  { %78 = vperm.xlu1 %130, %v64_v8  }
  0x20   :  { %72 = vperm.xlu0 %131, %v62_v9  }
  0x23   :  { %81 = vperm.xlu1 %130, %v65_v10  }
  0x8f   :  { %v21_v11 = vpop.xlane.xlu1 %20  ;;  %v17_v12 = vpop.xlane.xlu0 %16 }
  0x90   :  { %v28_v13 = vsub.f32 %v13_v0, %v21_v11  ;;  %v26_v14 = vsub.f32 %v11_v1, %v17_v12 }
  0x92   :  { %v31_v15 = vmul.f32 1.442695, %v26_v14  ;;  %v35_v16 = vmul.f32 1.442695, %v28_v13 }
  0x93   :  { %v23_v17 = vpop.xlane.xlu1 %22  ;;  %v19_v18 = vpop.xlane.xlu0 %18 }
  0x94   :  { %v29_v19 = vsub.f32 %v14_v3, %v23_v17  ;;  %v27_v20 = vsub.f32 %v12_v4, %v19_v18  ;;  %132 = vpow2.f32 %v31_v15 }
  0x95   :  { %134 = vpow2.f32 %v35_v16 }
  0x96   :  { %v33_v21 = vmul.f32 1.442695, %v27_v20  ;;  %v37_v22 = vmul.f32 1.442695, %v29_v19 }
  0x97   :  { %v70_v23 = vpop.permute.xlu1 %69  ;;  %v25_v24 = vpop.xlane.xlu0 %24 }
  0x98   :  { %v30_v25 = vsub.f32 %v15_v5, %v25_v24  ;;  %136 = vpow2.f32 %v33_v21  ;;  %vm83_vm2 = vcmp.eq.s32.totalorder %v67_v29, %v70_v23 }
  0x99   :  { %138 = vpow2.f32 %v37_v22  ;;  %v88_v42 = vsel %vm83_vm2, 0.95, %v153_v34 }
  0x9a   :  { %v39_v28 = vmul.f32 1.442695, %v30_v25  ;;  %v93_v45 = vadd.f32 0.000390625, %v88_v42 }
  0x9b   :  { %v76_v27 = vpop.permute.xlu1 %75 }
  0x9c   :  { %140 = vpow2.f32 %v39_v28  ;;  %vm85_vm3 = vcmp.eq.s32.totalorder %v67_v29, %v76_v27  ;;  %v98_v49 = vmul.f32 %v93_v45, %v26_v14 }
  0x9d   :  { %v90_v47 = vsel %vm85_vm3, 0.95, %v153_v34 }
  0x9e   :  { %v133_v30 = vpop.eup %132  ;;  %v95_v48 = vadd.f32 0.000390625, %v90_v47 }
  0x9f   :  { %v79_v31 = vpop.permute.xlu1 %78  ;;  %v73_v32 = vpop.permute.xlu0 %72  ;;  %41 = vadd.xlane.f32.xlu1 %v133_v30 }
  0xa0   :  { %vm86_vm0 = vcmp.eq.s32.totalorder %v67_v29, %v79_v31  ;;  %vm84_vm1 = vcmp.eq.s32.totalorder %v67_v29, %v73_v32  ;;  %v135_v33 = vpop.eup %134  ;;  %v100_v52 = vmul.f32 %v95_v48, %v28_v13 }
  0xa1   :  { %v89_v35 = vsel %vm84_vm1, 0.95, %v153_v34  ;;  %v91_v38 = vsel %vm86_vm0, 0.95, %v153_v34 }
  0xa2   :  { %v94_v36 = vadd.f32 0.000390625, %v89_v35  ;;  %v137_v37 = vpop.eup %136  ;;  %v96_v41 = vadd.f32 0.000390625, %v91_v38 }
  0xa3   :  { %45 = vadd.xlane.f32.xlu1 %v135_v33  ;;  %43 = vadd.xlane.f32.xlu0 %v137_v37  ;;  %v139_v40 = vpop.eup %138  ;;  %v82_v44 = vpop.permute.xlu1 %81 }
  0xa4   :  { %v99_v39 = vmul.f32 %v94_v36, %v27_v20  ;;  %v101_v46 = vmul.f32 %v96_v41, %v29_v19  ;;  %vm87_vm4 = vcmp.eq.s32.totalorder %v67_v29, %v82_v44 }
  0xa5   :  { %v92_v50 = vsel %vm87_vm4, 0.95, %v153_v34 }
  0xa6   :  { %v141_v43 = vpop.eup %140  ;;  %v97_v51 = vadd.f32 0.000390625, %v92_v50 }
  0xa7   :  { %47 = vadd.xlane.f32.xlu1 %v139_v40  ;;  %105 = vadd.xlane.f32.xlu0 %v99_v39 }
  0xa8   :  { %v102_v53 = vmul.f32 %v97_v51, %v30_v25 }
  0xab   :  { %49 = vadd.xlane.f32.xlu1 %v141_v43  ;;  %109 = vadd.xlane.f32.xlu0 %v101_v46 }
  0xaf   :  { %103 = vadd.xlane.f32.xlu1 %v98_v49 }
  0xb3   :  { %107 = vadd.xlane.f32.xlu1 %v100_v52 }
  0xb7   :  { %111 = vadd.xlane.f32.xlu1 %v102_v53 }
 0x12c   :  { %v42_v54 = vpop.xlane.xlu1 %41 }
 0x12d   :  { %142 = vlog2.f32 %v42_v54 }
 0x130   :  { %v46_v55 = vpop.xlane.xlu1 %45  ;;  %v44_v56 = vpop.xlane.xlu0 %43 }
 0x131   :  { %144 = vlog2.f32 %v46_v55 }
 0x132   :  { %146 = vlog2.f32 %v44_v56 }
 0x134   :  { %v48_v57 = vpop.xlane.xlu1 %47  ;;  %v106_v61 = vpop.xlane.xlu0 %105 }
 0x135   :  { %148 = vlog2.f32 %v48_v57 }
 0x137   :  { %v143_v58 = vpop.eup %142 }
 0x138   :  { %v50_v59 = vpop.xlane.xlu1 %49  ;;  %v52_v62 = vmul.f32 0.6931472, %v143_v58  ;;  %v110_v8 = vpop.xlane.xlu0 %109 }
 0x139   :  { %150 = vlog2.f32 %v50_v59 }
 0x13b   :  { %v145_v60 = vpop.eup %144 }
 0x13c   :  { %v147_v63 = vpop.eup %146  ;;  %v104_v0 = vpop.xlane.xlu1 %103  ;;  %v56_v5 = vmul.f32 0.6931472, %v145_v60 }
 0x13d   :  { %v54_v1 = vmul.f32 0.6931472, %v147_v63  ;;  %v113_v2 = vsub.f32 %v52_v62, %v104_v0 }
 0x13f   :  { %v149_v3 = vpop.eup %148  ;;  %v114_v4 = vsub.f32 %v54_v1, %v106_v61  ;;  %119 = vst.msk [vmem:[%s221_s2] sm:$0xff] %vm118_vm5, %v113_v2 }
 0x140   :  { %v58_v6 = vmul.f32 0.6931472, %v149_v3  ;;  %v108_v7 = vpop.xlane.xlu1 %107 }
 0x141   :  { %120 = vst.msk [vmem:[%s221_s2 + $0x8] sm:$0xff] %vm118_vm5, %v114_v4  ;;  %v115_v9 = vsub.f32 %v56_v5, %v108_v7 }
 0x142   :  { %v116_v10 = vsub.f32 %v58_v6, %v110_v8 }
 0x143   :  { %v151_v11 = vpop.eup %150  ;;  %121 = vst.msk [vmem:[%s221_s2 + $0x10] sm:$0xff] %vm118_vm5, %v115_v9 }
 0x144   :  { %122 = vst.msk [vmem:[%s221_s2 + $0x18] sm:$0xff] %vm118_vm5, %v116_v10  ;;  %v60_v12 = vmul.f32 0.6931472, %v151_v11  ;;  %v112_v13 = vpop.xlane.xlu1 %111 }
 0x146   :  { %v117_v14 = vsub.f32 %v60_v12, %v112_v13 }
 0x148   :  { %123 = vst.msk [vmem:[%s221_s2 + $0x20] sm:$0xff] %vm118_vm5, %v117_v14 }

</bundles_post_ra>
